<compile_context>
chip_gen: v7x
topology: tpu7x:2x2x1
jax: 0.10.0
libtpu: 0.0.40
codegen_flags: <defaults>
</compile_context>

<pallas_src>
import functools

import numpy as np

import jax
import jax.numpy as jnp
from jax.experimental import pallas as pl
from jax.experimental.pallas import tpu as pltpu


def _anchor_points_kernel(col_const_ref, col_slope_ref, o_ref, *,
                          block_rows, n_cols, rows_per_out_row):
    """out[r, c] = col_const[c] + col_slope[c] * (global_out_row(r) * rows_per_out_row).

    col_const_ref : (1, n_cols) f32 — x coordinate for x slots;
                    anchor-y offset + (folded_row + 0.5) * stride for y slots.
    col_slope_ref : (1, n_cols) f32 — stride on y slots, 0.0 on x slots.
    o_ref         : (block_rows, n_cols) f32 — lane-dense output tile.
    """
    r0 = pl.program_id(0) * block_rows
    r = jax.lax.broadcasted_iota(jnp.int32, (block_rows, n_cols), 0) + r0
    feat_row0 = (r * rows_per_out_row).astype(jnp.float32)
    o_ref[...] = col_const_ref[...] + col_slope_ref[...] * feat_row0


def _column_constants(W, row, line, stride, g):
    """Per-column constants for the lane-dense (H/g, g*W*A*2) layout.

    Column ordering (fastest last): folded feature row (g), feature-map x (W),
    anchor iy (row), anchor ix (line), coord c in {x, y} — identical to the flat
    layout of the reference (1, K*A, 2) output.
    """
    A = row * line
    wc = W * A * 2
    line_step = stride / line
    row_step = stride / row
    ax = (np.arange(line, dtype=np.float64) + 0.5) * line_step - stride / 2.0   # anchor x offsets
    ay = (np.arange(row, dtype=np.float64) + 0.5) * row_step - stride / 2.0     # anchor y offsets
    sx = (np.arange(W, dtype=np.float64) + 0.5) * stride                        # cell-center x shifts

    x_full = np.broadcast_to(sx[:, None, None] + ax[None, None, :], (W, row, line))
    y_anchor = np.broadcast_to(ay[None, :, None], (W, row, line))
    base = np.stack([x_full, y_anchor], axis=-1).reshape(wc)                    # (wc,)
    is_y = np.stack([np.zeros((W, row, line)), np.ones((W, row, line))],
                    axis=-1).reshape(wc)                                        # (wc,)

    # Fold g consecutive feature-map rows into one output row: the lane pattern repeats
    # g times and each repetition carries its own constant y shift.
    base_g = np.tile(base, g)
    is_y_g = np.tile(is_y, g)
    lane_feat_row = np.repeat(np.arange(g, dtype=np.float64), wc)

    col_const = base_g + is_y_g * (lane_feat_row + 0.5) * stride
    col_slope = is_y_g * stride
    C = g * wc
    return (col_const.astype(np.float32).reshape(1, C),
            col_slope.astype(np.float32).reshape(1, C))


def _choose_fold(H, wc, col_cap=2048):
    """Pick g | H so that C = g*wc is lane-dense (multiple of 128) and as wide as
    possible without exceeding `col_cap` lanes per output row."""
    divisors = [d for d in range(1, H + 1) if H % d == 0]
    candidates = [d for d in divisors if d * wc <= col_cap] or [1]
    lane_aligned = [d for d in candidates if (d * wc) % 128 == 0]
    pool = lane_aligned or candidates
    return max(pool)


def _pick_block_rows(R):
    for br in (512, 256, 128, 64, 32, 16, 8):
        if R % br == 0:
            return br
    return R  # full extent — always a legal block shape


def anchor_points_forward(image_shape, *, pyramid_level, row, line):
    """Matches AnchorPoints.forward: returns (1, H*W*row*line, 2) float32 on TPU."""
    H, W = int(image_shape[0]), int(image_shape[1])
    stride = float(2 ** pyramid_level)
    A = row * line
    wc = W * A * 2

    g = _choose_fold(H, wc)        # feature rows folded per output row
    R = H // g                     # output rows
    C = g * wc                     # output lanes per row (contiguous in memory)
    block_rows = _pick_block_rows(R)

    col_const_np, col_slope_np = _column_constants(W, row, line, stride, g)
    col_const = jnp.asarray(col_const_np)
    col_slope = jnp.asarray(col_slope_np)

    kernel = functools.partial(_anchor_points_kernel,
                               block_rows=block_rows, n_cols=C, rows_per_out_row=g)

    out = pl.pallas_call(
        kernel,
        out_shape=jax.ShapeDtypeStruct((R, C), jnp.float32),
        grid=(R // block_rows,),
        in_specs=[
            pl.BlockSpec((1, C), lambda i: (0, 0)),   # constants stay resident in VMEM
            pl.BlockSpec((1, C), lambda i: (0, 0)),
        ],
        out_specs=pl.BlockSpec((block_rows, C), lambda i: (i, 0)),
        compiler_params=pltpu.CompilerParams(dimension_semantics=("parallel",)),
    )(col_const, col_slope)

    # (R, C) and (1, H*W*A, 2) have identical flat row-major layout: metadata-only reshape.
    return out.reshape(1, H * W * A, 2)


# --- pure-numpy reference (verbatim port of the PyTorch module) --------------
def _ref_anchor_points(image_shape, pyramid_level, row, line):
    stride = 2 ** pyramid_level
    row_step = stride / row
    line_step = stride / line
    shift_x = (np.arange(1, line + 1) - 0.5) * line_step - stride / 2
    shift_y = (np.arange(1, row + 1) - 0.5) * row_step - stride / 2
    shift_x, shift_y = np.meshgrid(shift_x, shift_y)
    anchor_points = np.vstack((shift_x.ravel(), shift_y.ravel())).transpose()

    shift_x = (np.arange(0, image_shape[1]) + 0.5) * stride
    shift_y = (np.arange(0, image_shape[0]) + 0.5) * stride
    shift_x, shift_y = np.meshgrid(shift_x, shift_y)
    shifts = np.vstack((shift_x.ravel(), shift_y.ravel())).transpose()

    A = anchor_points.shape[0]
    K = shifts.shape[0]
    all_anchor_points = (anchor_points.reshape((1, A, 2)) +
                         shifts.reshape((1, K, 2)).transpose((1, 0, 2)))
    return all_anchor_points.reshape((1, K * A, 2)).astype(np.float32)


if __name__ == "__main__":
    pyramid_level = 3            # stride = 8
    row, line = 2, 2             # 4 anchor points per feature-map cell

    key = jax.random.PRNGKey(0)
    # AnchorPoints.forward consumes only the (static) feature-map shape; build a
    # deterministic dummy feature map just to derive that shape.
    feat = jax.random.normal(key, (2, 4, 16, 16), jnp.float32)
    image_shape = feat.shape[2:]                 # (16, 16)

    out = anchor_points_forward(image_shape, pyramid_level=pyramid_level, row=row, line=line)
    out = jax.block_until_ready(out)

    ref = _ref_anchor_points(image_shape, pyramid_level, row, line)
    expected_shape = (1, image_shape[0] * image_shape[1] * row * line, 2)
    assert out.shape == expected_shape, (out.shape, expected_shape)
    assert np.allclose(np.asarray(out), ref, atol=1e-4, rtol=1e-4), "mismatch vs reference"

    # TODO(synk): the original returns a CUDA tensor; here the result is a TPU-resident
    # jnp array (device placement is the only intentional semantic difference).
    print("KERNEL_OK")
</pallas_src>

<mosaic_0001>
module attributes {stable_mosaic.version = 11 : i64} {
  func.func @_anchor_points_kernel(%arg0: i32, %arg1: memref<1x2048xf32, #tpu.memory_space<vmem>>, %arg2: memref<1x2048xf32, #tpu.memory_space<vmem>>, %arg3: memref<1x2048xf32, #tpu.memory_space<vmem>>) attributes {dimension_semantics = [#tpu.dimension_semantics<parallel>], iteration_bounds = array<i64: 1>, scalar_prefetch = 0 : i64, scratch_operands = 0 : i64, tpu.core_type = #tpu.core_type<tc>, window_params = [{pipeline_mode = #tpu.pipeline_mode<synchronous>, transform_indices = @transform_0, window_bounds = array<i64: 1, 2048>}, {pipeline_mode = #tpu.pipeline_mode<synchronous>, transform_indices = @transform_1, window_bounds = array<i64: 1, 2048>}, {transform_indices = @transform_2, window_bounds = array<i64: 1, 2048>}]} {
    %c1_i32 = arith.constant 1 : i32
    %0 = arith.muli %arg0, %c1_i32 : i32
    %1 = tpu.iota {dimensions = array<i32: 0>} : vector<1x2048xi32>
    %2 = vector.broadcast %0 : i32 to vector<1x2048xi32>
    %3 = arith.addi %1, %2 : vector<1x2048xi32>
    %c16_i32 = arith.constant 16 : i32
    %4 = vector.broadcast %c16_i32 : i32 to vector<1x2048xi32>
    %5 = arith.muli %3, %4 : vector<1x2048xi32>
    %6 = arith.sitofp %5 : vector<1x2048xi32> to vector<1x2048xf32>
    %c0 = arith.constant 0 : index
    %c0_0 = arith.constant 0 : index
    %7 = vector.load %arg1[%c0, %c0_0] : memref<1x2048xf32, #tpu.memory_space<vmem>>, vector<1x2048xf32>
    %c0_1 = arith.constant 0 : index
    %c0_2 = arith.constant 0 : index
    %8 = vector.load %arg2[%c0_1, %c0_2] : memref<1x2048xf32, #tpu.memory_space<vmem>>, vector<1x2048xf32>
    %9 = arith.mulf %8, %6 : vector<1x2048xf32>
    %10 = arith.addf %7, %9 : vector<1x2048xf32>
    %c0_3 = arith.constant 0 : index
    %c0_4 = arith.constant 0 : index
    %11 = vector.load %arg3[%c0_3, %c0_4] : memref<1x2048xf32, #tpu.memory_space<vmem>>, vector<1x2048xf32>
    tpu.vector_store %arg3[%c0_3, %c0_4], %10 {strides = array<i32>} : memref<1x2048xf32, #tpu.memory_space<vmem>>, vector<1x2048xf32>,
    return
  }
  func.func @transform_0(%arg0: i32) -> (i32, i32) {
    %c0_i32 = arith.constant 0 : i32
    %c0_i32_0 = arith.constant 0 : i32
    %c0_i32_1 = arith.constant 0 : i32
    return %c0_i32, %c0_i32_0 : i32, i32
  }
  func.func @transform_1(%arg0: i32) -> (i32, i32) {
    %c0_i32 = arith.constant 0 : i32
    %c0_i32_0 = arith.constant 0 : i32
    %c0_i32_1 = arith.constant 0 : i32
    return %c0_i32, %c0_i32_0 : i32, i32
  }
  func.func @transform_2(%arg0: i32) -> (i32, i32) {
    %c0_i32 = arith.constant 0 : i32
    %c0_i32_0 = arith.constant 0 : i32
    return %arg0, %c0_i32 : i32, i32
  }
}

</mosaic_0001>

<bundles_post_ra>
// kernel: tpu_custom_call.1
= control target key start
LH: loop header
LB: loop body
LE: loop exit
PB: predicated region body
PF: predicated region fallthrough
CT: control target
= control target key end

     0   :  { %7 = vsyncpa [#allocation3], 0  ;;  %s203_s0 = inlined_call_operand.hbm [shape: f32[1,2048], index: 0, kind: input, shape index: {}]   ;;  %s204_s1 = inlined_call_operand.hbm [shape: f32[1,2048], index: 1, kind: input, shape index: {}]   ;;  %s205_s2 = inlined_call_operand.hbm [shape: f32[1,2048], index: 2, kind: output, shape index: {}]  }
   0x1   :  { %8 = vsyncpa [#allocation6], 0 }
   0x2   :  { %9 = vsyncpa [#allocation4], 0  ;;  %s149_s9 = smov [#allocation2]   ;;  %s150_s11 = smov [#allocation5]  }
   0x3   :  { %s16_s10 = sshll.u32 %s149_s9, 4  ;;  %s26_s12 = sshll.u32 %s150_s11, 4  ;;  %s17_s10 = int_to_ptr.vmem [resolvable:$true] %s16_s10  ;;  %s27_s12 = int_to_ptr.vmem [resolvable:$true] %s26_s12 }
   0x4   :  { %s77_s15 = scalar_lea.hbm %s203_s0, 256 }
   0x5   :  { %p78_p0 = scmp.ne.s32.totalorder %s203_s0, %s77_s15  ;;  %p81_p1 = scmp.lt.u32.totalorder %s77_s15, %s203_s0 }
   0x7   :  { %p83_p2 = pnand %p81_p1, %p78_p0 }
   0x9   :  { %86 = shalt.err (!%p83_p2)
}
   0xa   :  { %s87_s20 = scalar_lea.vmem %s17_s10, 256  ;;  %p92_p4 = scmp.lt.s32.totalorder %s17_s10, %s17_s10 }
   0xb   :  { %p88_p3 = scmp.ne.s32.totalorder %s17_s10, %s87_s20  ;;  %p93_p5 = scmp.lt.s32.totalorder %s87_s20, %s87_s20 }
   0xd   :  { %p94_p6 = por %p93_p5, %p92_p4 }
   0xf   :  { %p95_p7 = pnand %p94_p6, %p88_p3 }
  0x11   :  { %98 = shalt.err (!%p95_p7)
}
  0x12   :  { %19 = dma.hbm_to_vmem [thread:$0]  %s203_s0, 256, %s17_s10, [#allocation3]  }
  0x13   :  { %s99_s25 = scalar_lea.hbm %s204_s1, 256 }
  0x14   :  { %p100_p8 = scmp.ne.s32.totalorder %s204_s1, %s99_s25  ;;  %p103_p9 = scmp.lt.u32.totalorder %s99_s25, %s204_s1 }
  0x16   :  { %p105_p10 = pnand %p103_p9, %p100_p8 }
  0x18   :  { %108 = shalt.err (!%p105_p10)
}
  0x19   :  { %s109_s30 = scalar_lea.vmem %s27_s12, 256  ;;  %p114_p12 = scmp.lt.s32.totalorder %s27_s12, %s27_s12 }
  0x1a   :  { %p110_p11 = scmp.ne.s32.totalorder %s27_s12, %s109_s30  ;;  %p115_p13 = scmp.lt.s32.totalorder %s109_s30, %s109_s30 }
  0x1c   :  { %p116_p0 = por %p115_p13, %p114_p12 }
  0x1e   :  { %p117_p1 = pnand %p116_p0, %p110_p11 }
  0x20   :  { %120 = shalt.err (!%p117_p1)
}
  0x21   :  { %29 = dma.hbm_to_vmem [thread:$0]  %s204_s1, 256, %s27_s12, [#allocation6]  }
  0x22   :  { %143 = dma.done.wait [#allocation3], 256  }
  0x23   :  { %144 = vsyncadd [#allocation3], 4294967040 }
  0x24   :  { %145 = dma.done.wait [#allocation6], 256  }
  0x25   :  { %146 = vsyncadd [#allocation6], 4294967040  ;;  %v36_v0 = vlaneseq  ;;  %v44_v5 = vld [vmem:[#allocation5] sm:$0xff]  ;;  %v45_v7 = vld [vmem:[#allocation5 + $0x8] sm:$0xff]  ;;  %s151_s4 = smov [#allocation7]  }
  0x26   :  { %v42_v8 = vld [vmem:[#allocation2] sm:$0xff]  ;;  %v43_v9 = vld [vmem:[#allocation2 + $0x8] sm:$0xff]  ;;  %s64_s5 = sshll.u32 %s151_s4, 4  ;;  %s65_s5 = int_to_ptr.vmem [resolvable:$true] %s64_s5 }
  0x27   :  { %v37_v1 = vshrl.u32 %v36_v0, 7  ;;  %s121_s1 = scalar_lea.vmem %s65_s5, 256  ;;  %p126_p3 = scmp.lt.s32.totalorder %s65_s5, %s65_s5 }
  0x28   :  { %p122_p2 = scmp.ne.s32.totalorder %s65_s5, %s121_s1  ;;  %p127_p4 = scmp.lt.s32.totalorder %s121_s1, %s121_s1 }
  0x29   :  { %v40_v2 = vmul.u32 16, %v37_v1  ;;  %v49_v3 = vsub.s32 0, %v37_v1 }
  0x2a   :  { %p128_p5 = por %p127_p4, %p126_p3 }
  0x2b   :  { %v41_v4 = vcvt.s32.f32 %v40_v2 }
  0x2c   :  { %p129_p6 = pnand %p128_p5, %p122_p2 }
  0x2d   :  { %v50_v6 = vrot.slane %v41_v4, %v49_v3 }
  0x2f   :  { %v52_v10 = vmul.f32 %v50_v6, %v44_v5  ;;  %v53_v11 = vmul.f32 %v50_v6, %v45_v7 }
  0x31   :  { %v54_v12 = vadd.f32 %v52_v10, %v42_v8  ;;  %v55_v13 = vadd.f32 %v53_v11, %v43_v9 }
  0x33   :  { %56 = vst [vmem:[#allocation7] sm:$0xff] %v54_v12  ;;  %57 = vst [vmem:[#allocation7 + $0x8] sm:$0xff] %v55_v13 }
  0x34   :  { %132 = shalt.err (!%p129_p6)
}
  0x35   :  { %s133_s8 = scalar_lea.hbm %s205_s2, 256 }
  0x36   :  { %p134_p7 = scmp.ne.s32.totalorder %s205_s2, %s133_s8  ;;  %p137_p8 = scmp.lt.u32.totalorder %s133_s8, %s205_s2 }
  0x38   :  { %p139_p9 = pnand %p137_p8, %p134_p7 }
  0x3a   :  { %142 = shalt.err (!%p139_p9)
}
  0x3b   :  { %67 = dma.vmem_to_hbm [thread:$0]  %s65_s5, 256, %s205_s2, [#allocation4]  }
  0x3c   :  { %147 = dma.done.wait [#allocation4], 256  }
  0x3d   :  { %148 = vsyncadd [#allocation4], 4294967040 }
  0x3e   :  { %71 = vsyncpa [#allocation3], 1 }
  0x3f   :  { %72 = vsyncpa [#allocation6], 1 }
  0x40   :  { %73 = vsyncpa [#allocation4], 1 }

</bundles_post_ra>
